<compile_context>
chip_gen: v7x
topology: tpu7x:2x2x1
jax: 0.10.0
libtpu: 0.0.40
codegen_flags: <defaults>
</compile_context>

<pallas_src>
import functools

import jax
import jax.numpy as jnp
from jax import lax
from jax.experimental import pallas as pl
from jax.experimental.pallas import tpu as pltpu

H = 32                  # hidden size h
CONV_FLAT = 1800        # conv.view(-1) size (8*15*15)
FLAT = 5                # flat feature size
ENT_FEAT = 5            # per-entity feature size (ent1: Linear(5, h))
M_TILE = 1024           # max batch rows per grid step (bf16 conv block ~3.7 MB)


def _matT(x, w):
    """x @ w.T with f32 accumulation; w stays in native torch (out, in) layout."""
    return lax.dot_general(x, w, (((1,), (1,)), ((), ())),
                           preferred_element_type=jnp.float32)


# ----------------------------------------------------------------------------
# Kernel: one M-tile of the batched FCAttention forward.
# ----------------------------------------------------------------------------
def _fcattention_kernel(
    conv_ref,        # (TM, 1800) bf16  conv.view(-1) rows
    flat_ref,        # (TM, 5)    f32
    ents_ref,        # (TM, 5)    f32   single entity row per sample
    w_ent_ref,       # (h, 5)     f32   ent1 weight (native out, in)
    b_ent_ref,       # (1, h)     f32
    w_attn_ref,      # (h, h)     f32   pre-folded attn.fc weight (W[:, :h]+W[:, h:])
    b_attn_ref,      # (1, h)     f32
    w_fc1_conv_ref,  # (h, 1800)  bf16  fc1 weight cols for the conv segment
    w_fc1_flat_ref,  # (h, 5)     f32   fc1 weight cols for the flat segment
    w_fc1_ent_ref,   # (h, h)     f32   fc1 weight cols for the ents segment
    b_fc1_ref,       # (1, h)     f32
    out_ref,         # (TM, h)    f32
):
    # ents = self.ent1(ents)                                      -> (TM, h)
    e = _matT(ents_ref[...], w_ent_ref[...]) + b_ent_ref[...]

    # Single-entity attention: the (1,1) softmax is identically 1.0, so
    # attended == e and cat((attended, e)) @ W.T folds into e @ W_sum.T
    # (W_sum pre-computed once in prepare_params).  ent_out = tanh(fc(...)).
    ent_out = jnp.tanh(_matT(e, w_attn_ref[...]) + b_attn_ref[...])

    # x = cat((conv.view(-1), flat, ents)); relu(fc1(x))          -> (TM, h)
    # Concat never materialized: three partial matmuls against the pre-split
    # fc1 weight, summed with f32 accumulation.
    out = (_matT(conv_ref[...], w_fc1_conv_ref[...])
           + _matT(flat_ref[...], w_fc1_flat_ref[...])
           + _matT(ent_out, w_fc1_ent_ref[...])
           + b_fc1_ref[...])
    out_ref[...] = jnp.maximum(out, 0.0)


# ----------------------------------------------------------------------------
# One-time parameter layout prep (NOT in the per-call path).
# ----------------------------------------------------------------------------
def prepare_params(params):
    h = params["w_fc1"].shape[0]
    w_attn = params["w_attn"]                       # (h, 2h) torch (out, in)
    w_fc1 = params["w_fc1"]                         # (h, 1800 + 5 + h)
    return dict(
        w_ent=params["w_ent"].astype(jnp.float32),                       # (h, 5)
        b_ent=params["b_ent"].reshape(1, -1).astype(jnp.float32),        # (1, h)
        # exact fold of the degenerate single-entity attention
        w_attn_sum=(w_attn[:, :h] + w_attn[:, h:]).astype(jnp.float32),  # (h, h)
        b_attn=params["b_attn"].reshape(1, -1).astype(jnp.float32),      # (1, h)
        # fc1 weight pre-split by input segment (concat order: conv, flat, ents)
        w_fc1_conv=w_fc1[:, :CONV_FLAT].astype(jnp.bfloat16),            # (h, 1800)
        w_fc1_flat=w_fc1[:, CONV_FLAT:CONV_FLAT + FLAT].astype(jnp.float32),  # (h, 5)
        w_fc1_ent=w_fc1[:, CONV_FLAT + FLAT:].astype(jnp.float32),       # (h, h)
        b_fc1=params["b_fc1"].reshape(1, -1).astype(jnp.float32),        # (1, h)
    )


def _choose_tm(batch, m_tile):
    """Pick the M-tile: a multiple of 16 (bf16 sublane packing, also satisfies
    the f32 multiple-of-8 rule), capped at the batch, and leaving >= 2 grid
    steps when the batch allows so v7x's two TensorCores both get work."""
    if batch <= 16:
        return batch                         # one block; block dim == full dim
    tm = max(16, min(m_tile, (batch // 16) * 16))
    if -(-batch // tm) < 2:                  # ceil-div: would collapse to 1 step
        tm = max(16, ((batch // 2) // 16) * 16)
    return tm


# ----------------------------------------------------------------------------
# Wrapper: pallas_call over a 1-D batch grid; no concat, no full-array pad.
# ----------------------------------------------------------------------------
@functools.partial(jax.jit, static_argnames=("m_tile",))
def fc_attention(conv, flat, ents, prep, m_tile=M_TILE):
    B = conv.shape[0]
    h = prep["w_fc1_ent"].shape[0]

    # The pre-folded attention is exact only for one entity row per sample.
    if ents.ndim >= 3:
        assert ents.shape[-2] == 1, "FCAttention fold assumes 1 entity row/sample"

    conv_rows = conv.reshape(B, CONV_FLAT)
    if conv_rows.dtype != jnp.bfloat16:
        # Halves the kernel's HBM read of the dominant operand; ideally the
        # producer already emits bf16 so this cast is a no-op.
        conv_rows = conv_rows.astype(jnp.bfloat16)
    flat_rows = flat.reshape(B, FLAT).astype(jnp.float32)
    ents_rows = ents.reshape(B, ENT_FEAT).astype(jnp.float32)

    tm = _choose_tm(B, m_tile)
    grid = (pl.cdiv(B, tm),)

    def row_spec(width):
        return pl.BlockSpec((tm, width), lambda i: (i, 0))

    def resident(shape):
        # Constant block index -> weight DMA'd once, VMEM-resident across grid.
        return pl.BlockSpec(shape, lambda i: (0, 0))

    out = pl.pallas_call(
        _fcattention_kernel,
        out_shape=jax.ShapeDtypeStruct((B, h), jnp.float32),
        grid=grid,
        in_specs=[
            row_spec(CONV_FLAT),                    # conv rows (bf16)
            row_spec(FLAT),                         # flat
            row_spec(ENT_FEAT),                     # ents
            resident((h, ENT_FEAT)),                # w_ent
            resident((1, h)),                       # b_ent
            resident((h, h)),                       # w_attn_sum
            resident((1, h)),                       # b_attn
            resident((h, CONV_FLAT)),               # w_fc1_conv (bf16)
            resident((h, FLAT)),                    # w_fc1_flat
            resident((h, h)),                       # w_fc1_ent
            resident((1, h)),                       # b_fc1
        ],
        out_specs=row_spec(h),
        compiler_params=pltpu.CompilerParams(
            dimension_semantics=("parallel",)),
    )(conv_rows, flat_rows, ents_rows,
      prep["w_ent"], prep["b_ent"],
      prep["w_attn_sum"], prep["b_attn"],
      prep["w_fc1_conv"], prep["w_fc1_flat"], prep["w_fc1_ent"], prep["b_fc1"])

    return out


# ----------------------------------------------------------------------------
# Deterministic parameter init (PyTorch Linear default: U(-1/sqrt(in), 1/sqrt(in))).
# ----------------------------------------------------------------------------
def init_params(key, h):
    def linear(key, out_dim, in_dim):
        kw, kb = jax.random.split(key)
        bound = 1.0 / jnp.sqrt(in_dim)
        w = jax.random.uniform(kw, (out_dim, in_dim), jnp.float32, -bound, bound)
        b = jax.random.uniform(kb, (out_dim,), jnp.float32, -bound, bound)
        return w, b

    k1, k2, k3 = jax.random.split(key, 3)
    w_fc1, b_fc1 = linear(k1, h, FLAT + CONV_FLAT + h)   # Linear(5 + 1800 + h, h)
    w_ent, b_ent = linear(k2, h, ENT_FEAT)               # Linear(5, h)
    w_attn, b_attn = linear(k3, h, 2 * h)                # Attention.fc = Linear(2h, h)
    return dict(w_fc1=w_fc1, b_fc1=b_fc1,
                w_ent=w_ent, b_ent=b_ent,
                w_attn=w_attn, b_attn=b_attn)


# ----------------------------------------------------------------------------
# Pure-JAX f32 reference: literal per-sample forward (same interpretation of
# the broken source), applied independently to each batch row.
# ----------------------------------------------------------------------------
def reference(conv, flat, ents, params):
    B = conv.shape[0]
    e = ents.reshape(B, -1) @ params["w_ent"].T + params["b_ent"]     # (B, h)

    def one_sample(e_row):
        e1 = e_row.reshape(1, -1)
        s = e1 @ e1.T                                                  # (1, 1)
        y = jnp.exp(s - jnp.max(s))
        scores = (y / jnp.sum(y)).reshape(1, -1)
        attended = jnp.sum(e1 * scores, axis=0).reshape(1, -1)
        cat1 = jnp.concatenate([attended, e1], axis=1)                 # (1, 2h)
        return jnp.tanh(cat1 @ params["w_attn"].T + params["b_attn"]).reshape(-1)

    ent_out = jax.vmap(one_sample)(e)                                  # (B, h)
    x = jnp.concatenate(
        [conv.reshape(B, -1), flat.reshape(B, -1), ent_out], axis=1)   # (B, 1805+h)
    return jax.nn.relu(x @ params["w_fc1"].T + params["b_fc1"])


if __name__ == "__main__":
    key = jax.random.PRNGKey(0)
    kc, kf, ke, kp = jax.random.split(key, 4)

    B = 32
    conv = jax.random.normal(kc, (B, 8, 15, 15), jnp.float32)   # flattens to 1800
    flat = jax.random.normal(kf, (B, FLAT), jnp.float32)        # (B, 5)
    ents = jax.random.normal(ke, (B, 1, ENT_FEAT), jnp.float32) # one entity row / sample
    params = init_params(kp, H)
    prep = prepare_params(params)   # one-time layout prep, outside the hot path

    out = fc_attention(conv, flat, ents, prep)
    out = jax.block_until_ready(out)

    ref = reference(conv, flat, ents, params)
    assert out.shape == (B, H), out.shape
    # bf16 on the (B,1800) conv matmul (f32 accumulation) -> loosened tolerance
    # vs. the pure-f32 reference.
    err = jnp.max(jnp.abs(out - ref))
    assert jnp.allclose(out, ref, atol=2e-2, rtol=2e-2), f"max abs err {err}"

    print("KERNEL_OK")
</pallas_src>

<mosaic_0001>
module attributes {stable_mosaic.version = 11 : i64} {
  func.func @_fcattention_kernel(%arg0: i32, %arg1: memref<16x1800xbf16, #tpu.memory_space<vmem>>, %arg2: memref<16x5xf32, #tpu.memory_space<vmem>>, %arg3: memref<16x5xf32, #tpu.memory_space<vmem>>, %arg4: memref<32x5xf32, #tpu.memory_space<vmem>>, %arg5: memref<1x32xf32, #tpu.memory_space<vmem>>, %arg6: memref<32x32xf32, #tpu.memory_space<vmem>>, %arg7: memref<1x32xf32, #tpu.memory_space<vmem>>, %arg8: memref<32x1800xbf16, #tpu.memory_space<vmem>>, %arg9: memref<32x5xf32, #tpu.memory_space<vmem>>, %arg10: memref<32x32xf32, #tpu.memory_space<vmem>>, %arg11: memref<1x32xf32, #tpu.memory_space<vmem>>, %arg12: memref<16x32xf32, #tpu.memory_space<vmem>>) attributes {dimension_semantics = [#tpu.dimension_semantics<parallel>], iteration_bounds = array<i64: 2>, scalar_prefetch = 0 : i64, scratch_operands = 0 : i64, tpu.core_type = #tpu.core_type<tc>, window_params = [{transform_indices = @transform_0, window_bounds = array<i64: 16, 1800>}, {transform_indices = @transform_1, window_bounds = array<i64: 16, 5>}, {transform_indices = @transform_2, window_bounds = array<i64: 16, 5>}, {pipeline_mode = #tpu.pipeline_mode<synchronous>, transform_indices = @transform_3, window_bounds = array<i64: 32, 5>}, {pipeline_mode = #tpu.pipeline_mode<synchronous>, transform_indices = @transform_4, window_bounds = array<i64: 1, 32>}, {pipeline_mode = #tpu.pipeline_mode<synchronous>, transform_indices = @transform_5, window_bounds = array<i64: 32, 32>}, {pipeline_mode = #tpu.pipeline_mode<synchronous>, transform_indices = @transform_6, window_bounds = array<i64: 1, 32>}, {pipeline_mode = #tpu.pipeline_mode<synchronous>, transform_indices = @transform_7, window_bounds = array<i64: 32, 1800>}, {pipeline_mode = #tpu.pipeline_mode<synchronous>, transform_indices = @transform_8, window_bounds = array<i64: 32, 5>}, {pipeline_mode = #tpu.pipeline_mode<synchronous>, transform_indices = @transform_9, window_bounds = array<i64: 32, 32>}, {pipeline_mode = #tpu.pipeline_mode<synchronous>, transform_indices = @transform_10, window_bounds = array<i64: 1, 32>}, {transform_indices = @transform_11, window_bounds = array<i64: 16, 32>}]} {
    %c0 = arith.constant 0 : index
    %c0_0 = arith.constant 0 : index
    %0 = vector.load %arg3[%c0, %c0_0] : memref<16x5xf32, #tpu.memory_space<vmem>>, vector<16x5xf32>
    %c0_1 = arith.constant 0 : index
    %c0_2 = arith.constant 0 : index
    %1 = vector.load %arg4[%c0_1, %c0_2] : memref<32x5xf32, #tpu.memory_space<vmem>>, vector<32x5xf32>
    %cst = arith.constant dense<0.000000e+00> : vector<16x32xf32>
    %2 = tpu.matmul %0, %1, %cst {dimension_numbers = #tpu.dot_dimension_numbers<[1], [1], [0], [0], [0, 0, 1, 0], [], []>} : vector<16x5xf32>, vector<32x5xf32>, vector<16x32xf32> -> vector<16x32xf32>
    %c0_3 = arith.constant 0 : index
    %c0_4 = arith.constant 0 : index
    %3 = vector.load %arg5[%c0_3, %c0_4] : memref<1x32xf32, #tpu.memory_space<vmem>>, vector<1x32xf32>
    %4 = vector.broadcast %3 : vector<1x32xf32> to vector<16x32xf32>
    %5 = arith.addf %2, %4 : vector<16x32xf32>
    %c0_5 = arith.constant 0 : index
    %c0_6 = arith.constant 0 : index
    %6 = vector.load %arg6[%c0_5, %c0_6] : memref<32x32xf32, #tpu.memory_space<vmem>>, vector<32x32xf32>
    %cst_7 = arith.constant dense<0.000000e+00> : vector<16x32xf32>
    %7 = tpu.matmul %5, %6, %cst_7 {dimension_numbers = #tpu.dot_dimension_numbers<[1], [1], [0], [0], [0, 0, 1, 0], [], []>} : vector<16x32xf32>, vector<32x32xf32>, vector<16x32xf32> -> vector<16x32xf32>
    %c0_8 = arith.constant 0 : index
    %c0_9 = arith.constant 0 : index
    %8 = vector.load %arg7[%c0_8, %c0_9] : memref<1x32xf32, #tpu.memory_space<vmem>>, vector<1x32xf32>
    %9 = vector.broadcast %8 : vector<1x32xf32> to vector<16x32xf32>
    %10 = arith.addf %7, %9 : vector<16x32xf32>
    %11 = math.tanh %10 : vector<16x32xf32>
    %c0_10 = arith.constant 0 : index
    %c0_11 = arith.constant 0 : index
    %12 = vector.load %arg1[%c0_10, %c0_11] : memref<16x1800xbf16, #tpu.memory_space<vmem>>, vector<16x1800xbf16>
    %c0_12 = arith.constant 0 : index
    %c0_13 = arith.constant 0 : index
    %13 = vector.load %arg8[%c0_12, %c0_13] : memref<32x1800xbf16, #tpu.memory_space<vmem>>, vector<32x1800xbf16>
    %cst_14 = arith.constant dense<0.000000e+00> : vector<16x32xf32>
    %14 = tpu.matmul %12, %13, %cst_14 {dimension_numbers = #tpu.dot_dimension_numbers<[1], [1], [0], [0], [0, 0, 1, 0], [], []>} : vector<16x1800xbf16>, vector<32x1800xbf16>, vector<16x32xf32> -> vector<16x32xf32>
    %c0_15 = arith.constant 0 : index
    %c0_16 = arith.constant 0 : index
    %15 = vector.load %arg2[%c0_15, %c0_16] : memref<16x5xf32, #tpu.memory_space<vmem>>, vector<16x5xf32>
    %c0_17 = arith.constant 0 : index
    %c0_18 = arith.constant 0 : index
    %16 = vector.load %arg9[%c0_17, %c0_18] : memref<32x5xf32, #tpu.memory_space<vmem>>, vector<32x5xf32>
    %cst_19 = arith.constant dense<0.000000e+00> : vector<16x32xf32>
    %17 = tpu.matmul %15, %16, %cst_19 {dimension_numbers = #tpu.dot_dimension_numbers<[1], [1], [0], [0], [0, 0, 1, 0], [], []>} : vector<16x5xf32>, vector<32x5xf32>, vector<16x32xf32> -> vector<16x32xf32>
    %18 = arith.addf %14, %17 : vector<16x32xf32>
    %c0_20 = arith.constant 0 : index
    %c0_21 = arith.constant 0 : index
    %19 = vector.load %arg10[%c0_20, %c0_21] : memref<32x32xf32, #tpu.memory_space<vmem>>, vector<32x32xf32>
    %cst_22 = arith.constant dense<0.000000e+00> : vector<16x32xf32>
    %20 = tpu.matmul %11, %19, %cst_22 {dimension_numbers = #tpu.dot_dimension_numbers<[1], [1], [0], [0], [0, 0, 1, 0], [], []>} : vector<16x32xf32>, vector<32x32xf32>, vector<16x32xf32> -> vector<16x32xf32>
    %21 = arith.addf %18, %20 : vector<16x32xf32>
    %c0_23 = arith.constant 0 : index
    %c0_24 = arith.constant 0 : index
    %22 = vector.load %arg11[%c0_23, %c0_24] : memref<1x32xf32, #tpu.memory_space<vmem>>, vector<1x32xf32>
    %23 = vector.broadcast %22 : vector<1x32xf32> to vector<16x32xf32>
    %24 = arith.addf %21, %23 : vector<16x32xf32>
    %cst_25 = arith.constant 0.000000e+00 : f32
    %25 = vector.broadcast %cst_25 : f32 to vector<16x32xf32>
    %26 = arith.maximumf %24, %25 : vector<16x32xf32>
    %c0_26 = arith.constant 0 : index
    %c0_27 = arith.constant 0 : index
    %27 = vector.load %arg12[%c0_26, %c0_27] : memref<16x32xf32, #tpu.memory_space<vmem>>, vector<16x32xf32>
    tpu.vector_store %arg12[%c0_26, %c0_27], %26 {strides = array<i32>} : memref<16x32xf32, #tpu.memory_space<vmem>>, vector<16x32xf32>,
    return
  }
  func.func @transform_0(%arg0: i32) -> (i32, i32) {
    %c0_i32 = arith.constant 0 : i32
    %c0_i32_0 = arith.constant 0 : i32
    return %arg0, %c0_i32 : i32, i32
  }
  func.func @transform_1(%arg0: i32) -> (i32, i32) {
    %c0_i32 = arith.constant 0 : i32
    %c0_i32_0 = arith.constant 0 : i32
    return %arg0, %c0_i32 : i32, i32
  }
  func.func @transform_2(%arg0: i32) -> (i32, i32) {
    %c0_i32 = arith.constant 0 : i32
    %c0_i32_0 = arith.constant 0 : i32
    return %arg0, %c0_i32 : i32, i32
  }
  func.func @transform_3(%arg0: i32) -> (i32, i32) {
    %c0_i32 = arith.constant 0 : i32
    %c0_i32_0 = arith.constant 0 : i32
    %c0_i32_1 = arith.constant 0 : i32
    return %c0_i32, %c0_i32_0 : i32, i32
  }
  func.func @transform_4(%arg0: i32) -> (i32, i32) {
    %c0_i32 = arith.constant 0 : i32
    %c0_i32_0 = arith.constant 0 : i32
    %c0_i32_1 = arith.constant 0 : i32
    return %c0_i32, %c0_i32_0 : i32, i32
  }
  func.func @transform_5(%arg0: i32) -> (i32, i32) {
    %c0_i32 = arith.constant 0 : i32
    %c0_i32_0 = arith.constant 0 : i32
    %c0_i32_1 = arith.constant 0 : i32
    return %c0_i32, %c0_i32_0 : i32, i32
  }
  func.func @transform_6(%arg0: i32) -> (i32, i32) {
    %c0_i32 = arith.constant 0 : i32
    %c0_i32_0 = arith.constant 0 : i32
    %c0_i32_1 = arith.constant 0 : i32
    return %c0_i32, %c0_i32_0 : i32, i32
  }
  func.func @transform_7(%arg0: i32) -> (i32, i32) {
    %c0_i32 = arith.constant 0 : i32
    %c0_i32_0 = arith.constant 0 : i32
    %c0_i32_1 = arith.constant 0 : i32
    return %c0_i32, %c0_i32_0 : i32, i32
  }
  func.func @transform_8(%arg0: i32) -> (i32, i32) {
    %c0_i32 = arith.constant 0 : i32
    %c0_i32_0 = arith.constant 0 : i32
    %c0_i32_1 = arith.constant 0 : i32
    return %c0_i32, %c0_i32_0 : i32, i32
  }
  func.func @transform_9(%arg0: i32) -> (i32, i32) {
    %c0_i32 = arith.constant 0 : i32
    %c0_i32_0 = arith.constant 0 : i32
    %c0_i32_1 = arith.constant 0 : i32
    return %c0_i32, %c0_i32_0 : i32, i32
  }
  func.func @transform_10(%arg0: i32) -> (i32, i32) {
    %c0_i32 = arith.constant 0 : i32
    %c0_i32_0 = arith.constant 0 : i32
    %c0_i32_1 = arith.constant 0 : i32
    return %c0_i32, %c0_i32_0 : i32, i32
  }
  func.func @transform_11(%arg0: i32) -> (i32, i32) {
    %c0_i32 = arith.constant 0 : i32
    %c0_i32_0 = arith.constant 0 : i32
    return %arg0, %c0_i32 : i32, i32
  }
}

</mosaic_0001>

<bundles_post_ra>
// kernel: fc_attention.1
= control target key start
LH: loop header
LB: loop body
LE: loop exit
PB: predicated region body
PF: predicated region fallthrough
CT: control target
= control target key end

     0   :  { %s2394_s0 = inlined_call_operand.vmem [shape: bf16[32,1800], index: 0, kind: input, shape index: {}]   ;;  %s2395_s1 = inlined_call_operand.vmem [shape: f32[32,5], index: 1, kind: input, shape index: {}]   ;;  %s2396_s2 = inlined_call_operand.vmem [shape: f32[32,5], index: 2, kind: input, shape index: {}]   ;;  %s2397_s3 = inlined_call_operand.vmem [shape: f32[32,5], index: 3, kind: input, shape index: {}]   ;;  %s2398_s4 = inlined_call_operand.vmem [shape: f32[1,32], index: 4, kind: input, shape index: {}]   ;;  %s2399_s5 = inlined_call_operand.vmem [shape: f32[32,32], index: 5, kind: input, shape index: {}]   ;;  %s2400_s6 = inlined_call_operand.vmem [shape: f32[1,32], index: 6, kind: input, shape index: {}]   ;;  %s2401_s7 = inlined_call_operand.vmem [shape: bf16[32,1800], index: 7, kind: input, shape index: {}]   ;;  %s2402_s8 = inlined_call_operand.vmem [shape: f32[32,5], index: 8, kind: input, shape index: {}]   ;;  %s2403_s9 = inlined_call_operand.vmem [shape: f32[32,32], index: 9, kind: input, shape index: {}]   ;;  %s2404_s10 = inlined_call_operand.vmem [shape: f32[1,32], index: 10, kind: input, shape index: {}]   ;;  %s2405_s11 = inlined_call_operand.hbm [shape: f32[32,32], index: 11, kind: output, shape index: {}]  }
   0x1   :  { %2406 = sst [smem:[#allocation6_spill]] %s2397_s3 }
   0x2   :  { %16 = vsyncpa [#allocation3], 0 }
   0x3   :  { %18 = vsyncpa [#allocation3 + $0x1], 0  ;;  %s2056_s17 = smov 0   ;;  %s2058_s18 = smov 0  }
   0x4   :  { %s2060_s19 = smov 0   ;;  %s2062_s20 = smov 0  }
   0x5 LB: > { %s2077_s21 = sadd.s32 4294967295, %s1989_s20   ;;  %s1572_s22 = sadd.s32 4294967294, %s1989_s20   ;;  %s1989_s20 = sphi %s2062_s20, %s2419_s20   ;;  %s1985_s19 = sphi %s2060_s19, %s2418_s19   ;;  %s1981_s18 = sphi %s2058_s18, %s2417_s18   ;;  %s1977_s17 = sphi %s2056_s17, %s2416_s17  }
   0x6   : > { %s2081_s23 = sadd.s32 1, %s1989_s20   ;;  %s277_s24 = sadd.s32 1, %s1985_s19 }
   0x7   : > { %s274_s25 = ssub.s32 %s1989_s20, %s2081_s23  ;;  %p287_p0 = scmp.ne.s32.totalorder %s1985_s19, %s1981_s18 }
   0x8   : > { %p275_p1 = scmp.eq.s32.totalorder %s274_s25, 0  ;;  %p288_p2 = scmp.eq.s32.totalorder %s2077_s21, 1 }
   0x9   : > { %p293_p3 = scmp.ne.s32.totalorder %s1981_s18, %s1977_s17  ;;  %p294_p4 = scmp.eq.s32.totalorder %s1572_s22, 1 }
   0xa   : > { %s2092_s26 = scalar_select %p275_p1, %s1985_s19, %s277_s24  }
   0xb   : > { %p2094_p5 = por %p288_p2, %p287_p0  ;;  %p2098_p6 = por %p294_p4, %p293_p3 }
   0xc   : > { %2407 = sst [smem:[#allocation5_spill]] %s2092_s26  ;;  %p1575_p7 = scmp.ge.s32.totalorder %s1989_s20, 1 }
   0xd   : > { %p364_p8 = scmp.lt.s32.totalorder %s1989_s20, 3 }
   0xf   : > { %p365_p9 = pnand %p1575_p7, %p364_p8 }
  0x10   : > { %s2410_s3 = sld [smem:[#allocation6_spill]] (!%p365_p9)  ;;  %vm449_vm0 = vcmask (!%p365_p9), 39936   ;;  %s1577_s16 = sshll.u32 (!%p365_p9), %s2077_s21, 1  ;;  %v543_v7 = vld [vmem:[%s2399_s5] sm:$0xff] (!%p365_p9)  ;;  %v544_v8 = vld [vmem:[%s2399_s5 + $0x8] sm:$0xff] (!%p365_p9)  ;;  %vm554_vm2 = vcmask (!%p365_p9), 261120  }
  0x11   : > { %368 = sbr.rel (%p365_p9) target bundleno = 718 (0x2ce), region = 64  ;;  %vm2116_vm1 = vmpackc.low (!%p365_p9), %vm449_vm0, %vm449_vm0  ;;  %p416_p10 = scmp.lt.s32.totalorder (!%p365_p9), %s1577_s16, 3  ;;  %v1753_v11 = vpack.c.bf16 (!%p365_p9), %v544_v8, %v543_v7  ;;  %v545_v12 = vld [vmem:[%s2399_s5 + $0x10] sm:$0xff] (!%p365_p9)  ;;  %v546_v13 = vld [vmem:[%s2399_s5 + $0x18] sm:$0xff] (!%p365_p9)  ;;  %v1991_v48 = vmov (!%p365_p9), 0.0   ;;  %vm1022_vm4 = vcmask (!%p365_p9), 64512  }
  0x12   : > { %vm2151_vm3 = vmpackc.low (!%p365_p9), %vm554_vm2, %vm554_vm2  ;;  %v1759_v15 = vpack.c.bf16 (!%p365_p9), %v546_v13, %v545_v12  ;;  %v1857_v16 = vld [vmem:[%s2401_s7 + $0x14] ss:$60 sps:$4 sm:$0xff] (!%p365_p9)   ;;  %v1860_v18 = vld [vmem:[%s2401_s7 + $0x8c] ss:$60 sps:$4 sm:$0xff] (!%p365_p9)   ;;  %vm1992_vm5 = vmmov (!%p365_p9), 0   ;;  %s1661_s12 = sshll.u32 (!%p365_p9), %s2077_s21, 8 }
  0x13   : > { %v1859_v17 = vld [vmem:[%s2401_s7 + $0x10] ss:$60 sps:$4 sm:$0xff] (!%p365_p9)   ;;  %1114 = vmatprep.subr.bf16.mxu0 (!%p365_p9), %v1857_v16  ;;  %v700_v20 = vld [vmem:[%s2402_s8] sm:$0xff] (!%p365_p9)  ;;  %v1868_v24 = vld [vmem:[%s2401_s7 + $0x1c] ss:$60 sps:$4 sm:$0xff] (!%p365_p9)   ;;  %s1993_s22 = smov (!%p365_p9), [#allocation2]  }
  0x14   : > { %1115 = vmatpush1.bf16.xpose.msra.mxu0 (!%p365_p9), %v1859_v17  ;;  %v701_v21 = vld [vmem:[%s2402_s8 + $0x8] sm:$0xff] (!%p365_p9)  ;;  %v1866_v26 = vld [vmem:[%s2401_s7 + $0x18] ss:$60 sps:$4 sm:$0xff] (!%p365_p9)   ;;  %v1877_v30 = vld [vmem:[%s2401_s7 + $0x24] ss:$60 sps:$4 sm:$0xff] (!%p365_p9)  }
  0x15   : > { %1116 = vmatprep.subr.bf16.mxu0 (!%p365_p9), %v1860_v18  ;;  %v2189_v22 = vpack.c.bf16 (!%p365_p9), %v701_v21, %v700_v20  ;;  %v1862_v23 = vld [vmem:[%s2401_s7 + $0x88] ss:$60 sps:$4 sm:$0xff] (!%p365_p9)   ;;  %v1871_v28 = vld [vmem:[%s2401_s7 + $0x94] ss:$60 sps:$4 sm:$0xff] (!%p365_p9)   ;;  %v1875_v32 = vld [vmem:[%s2401_s7 + $0x20] ss:$60 sps:$4 sm:$0xff] (!%p365_p9)  }
  0x16   : > { %v438_v0 = vld [vmem:[%s2410_s3] sm:$0xff] (!%p365_p9)  ;;  %v439_v1 = vld [vmem:[%s2410_s3 + $0x8] sm:$0xff] (!%p365_p9)  ;;  %v440_v2 = vld [vmem:[%s2410_s3 + $0x10] sm:$0xff] (!%p365_p9) }
  0x17   : > { %v1741_v3 = vpack.c.bf16 (!%p365_p9), %v439_v1, %v438_v0  ;;  %v441_v5 = vld [vmem:[%s2410_s3 + $0x18] sm:$0xff] (!%p365_p9)  ;;  %v1869_v29 = vld [vmem:[%s2401_s7 + $0x90] ss:$60 sps:$4 sm:$0xff] (!%p365_p9)   ;;  %v1884_v38 = vld [vmem:[%s2401_s7 + $0x28] ss:$60 sps:$4 sm:$0xff] (!%p365_p9)  }
  0x18   : > { %v1747_v6 = vpack.c.bf16 %v441_v5, %v440_v2  ;;  %s2421_s16 = smov (!%p416_p10, %s1577_s16), 3  ;;  %v1880_v34 = vld [vmem:[%s2401_s7 + $0x9c] ss:$60 sps:$4 sm:$0xff]   ;;  %v1886_v36 = vld [vmem:[%s2401_s7 + $0x2c] ss:$60 sps:$4 sm:$0xff]   ;;  %v702_v57 = vld [vmem:[%s2402_s8 + $0x10] sm:$0xff] }
  0x19   : > { %1743 = vmatprep.subr.msk.bf16.mxu1 %vm2116_vm1, %v1741_v3  ;;  %s1813_s13 = smul.u32 60, %s2421_s16  ;;  %s1580_s14 = sshll.u32 %s2421_s16, 3  ;;  %v1878_v35 = vld [vmem:[%s2401_s7 + $0x98] ss:$60 sps:$4 sm:$0xff]   ;;  %v1889_v40 = vld [vmem:[%s2401_s7 + $0xa4] ss:$60 sps:$4 sm:$0xff]  }
  0x1a   : > { %1746 = vmatpush3.bf16.xpose.msk.msra.mxu1 %vm2116_vm1, %v1741_v3  ;;  %s432_s24 = scalar_lea.vmem %s2396_s2, %s1580_s14  ;;  %v1887_v41 = vld [vmem:[%s2401_s7 + $0xa0] ss:$60 sps:$4 sm:$0xff]   ;;  %v1898_v42 = vld [vmem:[%s2401_s7 + $0x34] ss:$60 sps:$4 sm:$0xff]   ;;  %v1904_v46 = vld [vmem:[%s2401_s7 + $0xac] ss:$60 sps:$4 sm:$0xff]   ;;  %s426_s3 = scalar_lea.vmem %s2395_s1, %s1580_s14 }
  0x1b   : > { %1749 = vmatprep.subr.msk.bf16.mxu1 %vm2116_vm1, %v1747_v6  ;;  %s2147_s25 = scalar_lea.vmem %s2394_s0, %s1813_s13  ;;  %v436_v9 = vld [vmem:[%s432_s24] sm:$0xff]  ;;  %v437_v14 = vld [vmem:[%s432_s24 + $0x8] sm:$0xff]  ;;  %v1914_v49 = vld [vmem:[%s2401_s7 + $0x38] ss:$60 sps:$4 sm:$0xff]   ;;  %s412_s24 = sand.u32 1, %s1981_s18  }
  0x1c   : > { %1697 = vmatprep.mubr.msk.f32.mxu1 %vm449_vm0, %v436_v9  ;;  %v1865_v19 = vld [vmem:[%s2147_s25 + $0x14] ss:$60 sps:$4 sm:$0xff]   ;;  %1117 = vmatpush1.bf16.xpose.msra.mxu0 %v1862_v23  ;;  %v1874_v27 = vld [vmem:[%s2147_s25 + $0x1c] ss:$60 sps:$4 sm:$0xff]   ;;  %v1883_v33 = vld [vmem:[%s2147_s25 + $0x24] ss:$60 sps:$4 sm:$0xff]   ;;  %s2347_s16 = scalar_lea.hbm %s2405_s11, %s1661_s12 }
  0x1d   : > { %1146 = vmatprep.mubr.bf16.mxu0 %v1865_v19  ;;  %1155 = vmatprep.subr.bf16.mxu0 %v1868_v24  ;;  %v1863_v25 = vld [vmem:[%s2147_s25 + $0x10] ss:$60 sps:$4 sm:$0xff]   ;;  %v1872_v31 = vld [vmem:[%s2147_s25 + $0x18] ss:$60 sps:$4 sm:$0xff]   ;;  %v1881_v37 = vld [vmem:[%s2147_s25 + $0x20] ss:$60 sps:$4 sm:$0xff]  }
  0x1e   : > { %v1895_v39 = vld [vmem:[%s2147_s25 + $0x2c] ss:$60 sps:$4 sm:$0xff]   ;;  %v1913_v45 = vld [vmem:[%s2147_s25 + $0x34] ss:$60 sps:$4 sm:$0xff]   ;;  %v1027_v51 = vsel %vm1022_vm4, %v1914_v49, 0  ;;  %v703_v58 = vld [vmem:[%s2402_s8 + $0x18] sm:$0xff] }
  0x1f   : > { %v1893_v43 = vld [vmem:[%s2147_s25 + $0x28] ss:$60 sps:$4 sm:$0xff]   ;;  %v1896_v44 = vld [vmem:[%s2401_s7 + $0x30] ss:$60 sps:$4 sm:$0xff]   ;;  %v1922_v54 = vld [vmem:[%s2147_s25 + $0x38] ss:$60 sps:$4 sm:$0xff]   ;;  %v1771_v62 = vpack.c.bf16 %v703_v58, %v702_v57 }
  0x20   : > { %v1902_v47 = vld [vmem:[%s2401_s7 + $0xa8] ss:$60 sps:$4 sm:$0xff]   ;;  %v1911_v50 = vld [vmem:[%s2147_s25 + $0x30] ss:$60 sps:$4 sm:$0xff]   ;;  %v1583_v55 = vld [vmem:[%s2398_s4] ss:$0 sm:$0xff] }
  0x21   : > { %v1918_v52 = vld [vmem:[%s2401_s7 + $0xb0] ss:$60 sps:$4 sm:$0xff]   ;;  %v698_v63 = vld [vmem:[%s426_s3] sm:$0xff]  ;;  %v1901_v5 = vld [vmem:[%s2401_s7 + $0x7c] ss:$60 sps:$4 sm:$0xff]   ;;  %s1576_s29 = sshll.u32 %s412_s24, 4 }
  0x22   : > { %1752 = vmatpush3.bf16.xpose.msk.msra.mxu1 %vm2116_vm1, %v1747_v6  ;;  %v1030_v53 = vsel %vm1022_vm4, %v1918_v52, 0  ;;  %v1892_v0 = vld [vmem:[%s2401_s7 + $0x4] ss:$60 sps:$4 sm:$0xff]   ;;  %v699_v1 = vld [vmem:[%s426_s3 + $0x8] sm:$0xff]  ;;  %v1899_v4 = vld [vmem:[%s2401_s7 + $0x78] ss:$60 sps:$4 sm:$0xff]  }
  0x23   : > { %1755 = vmatprep.subr.msk.bf16.mxu1 %vm2151_vm3, %v1753_v11  ;;  %1147 = vmatmul.mubr.bf16.vlgmr.msra.gmra.mrb[0].mxu0 %v1863_v25  ;;  %v1890_v2 = vld [vmem:[%s2401_s7] ss:$60 sps:$4 sm:$0xff]   ;;  %v1910_v6 = vld [vmem:[%s2401_s7 + $0xc] ss:$60 sps:$4 sm:$0xff]   ;;  %v1362_v17 = vld [vmem:[%s2403_s9 + $0x10] sm:$0xff]  ;;  %s414_s3 = scalar_lea.vmem [#allocation2], %s1576_s29 }
  0x24   : > { %1156 = vmatpush1.bf16.xpose.msra.mxu0 %v1866_v26  ;;  %1187 = vmatprep.mubr.bf16.mxu0 %v1874_v27  ;;  %v1907_v3 = vld [vmem:[%s2147_s25 + $0x4] ss:$60 sps:$4 sm:$0xff]   ;;  %v1921_v9 = vld [vmem:[%s2147_s25 + $0xc] ss:$60 sps:$4 sm:$0xff]   ;;  %v1363_v18 = vld [vmem:[%s2403_s9 + $0x18] sm:$0xff]  ;;  %s1486_s13 = sshll.u32 %s414_s3, 4  ;;  %s2349_s13 = int_to_ptr.vmem [resolvable:$true] %s1486_s13 }
  0x25   : > { %1157 = vmatprep.subr.bf16.mxu0 %v1871_v28  ;;  %v1905_v7 = vld [vmem:[%s2147_s25] ss:$60 sps:$4 sm:$0xff]   ;;  %v1908_v8 = vld [vmem:[%s2401_s7 + $0x8] ss:$60 sps:$4 sm:$0xff]   ;;  %v1783_v19 = vpack.c.bf16 %v1363_v18, %v1362_v17  ;;  %s2353_s21 = scalar_lea.sflag [#allocation3], %s412_s24  ;;  %s1927_s14 = scalar_lea.vmem %s2349_s13, 256 }
  0x26   : > { %v1915_v12 = vld [vmem:[%s2401_s7 + $0x80] ss:$60 sps:$4 sm:$0xff]   ;;  %v1919_v13 = vld [vmem:[%s2147_s25 + $0x8] ss:$60 sps:$4 sm:$0xff]   ;;  %p1928_p11 = scmp.ne.s32.totalorder %s2349_s13, %s1927_s14  ;;  %s1931_s29 = sshll.u32 %s1993_s22, 4  ;;  %s1932_s29 = int_to_ptr.vmem [resolvable:$false] %s1931_s29 }
  0x27   : > { %v1590_v24 = vld [vmem:[%s2400_s6] ss:$0 sm:$0xff]  ;;  %s1933_s30 = scalar_lea.vmem %s1932_s29, 512  ;;  %p1934_p0 = scmp.lt.s32.totalorder %s2349_s13, %s1932_s29 }
  0x28   : > { %p1929_p12 = pnand %p1928_p11, %p2094_p5  ;;  %p1935_p1 = scmp.lt.s32.totalorder %s1933_s30, %s1927_s14 }
  0x29   : > { %1698 = vmatmul.mubr.msk.f32.vlgmr.msra.gmra.mrb[0].mxu1 %vm449_vm0, %v437_v14  ;;  %v1360_v14 = vld [vmem:[%s2403_s9] sm:$0xff] }
  0x2a   : > { %1758 = vmatpush3.bf16.xpose.msk.msra.mxu1 %vm2151_vm3, %v1753_v11  ;;  %v1917_v11 = vld [vmem:[%s2401_s7 + $0x84] ss:$60 sps:$4 sm:$0xff]   ;;  %p1930_p13 = pneg %p1929_p12  ;;  %p1936_p2 = por %p1935_p1, %p1934_p0 }
  0x2b   : > { %1761 = vmatprep.subr.msk.bf16.mxu1 %vm2151_vm3, %v1759_v15 }
  0x2c   : > { %1158 = vmatpush1.bf16.xpose.msra.mxu0 %v1869_v29  ;;  %p1937_p3 = pnand %p1936_p2, %p1930_p13 }
  0x2d   : > { %1196 = vmatprep.subr.bf16.mxu0 %v1877_v30 }
  0x32   : > { %1764 = vmatpush3.bf16.xpose.msk.msra.mxu1 %vm2151_vm3, %v1759_v15  ;;  %v1361_v15 = vld [vmem:[%s2403_s9 + $0x8] sm:$0xff] }
  0x33   : > { %1767 = vmatprep.subr.msk.bf16.mxu1 %vm2116_vm1, %v2189_v22  ;;  %1188 = vmatmul.mubr.bf16.vlgmr.msra.gmra.mrb[0].mxu0 %v1872_v31  ;;  %v1777_v16 = vpack.c.bf16 %v1361_v15, %v1360_v14 }
  0x34   : > { %1197 = vmatpush1.bf16.xpose.msra.mxu0 %v1875_v32  ;;  %1228 = vmatprep.mubr.bf16.mxu0 %v1883_v33 }
  0x35   : > { %1198 = vmatprep.subr.bf16.mxu0 %v1880_v34 }
  0x3c   : > { %1199 = vmatpush1.bf16.xpose.msra.mxu0 %v1878_v35 }
  0x3d   : > { %1237 = vmatprep.subr.bf16.mxu0 %v1886_v36 }
  0x43   : > { %1229 = vmatmul.mubr.bf16.vlgmr.msra.gmra.mrb[0].mxu0 %v1881_v37 }
  0x44   : > { %1238 = vmatpush1.bf16.xpose.msra.mxu0 %v1884_v38  ;;  %1269 = vmatprep.mubr.bf16.mxu0 %v1895_v39 }
  0x45   : > { %1239 = vmatprep.subr.bf16.mxu0 %v1889_v40 }
  0x4c   : > { %1240 = vmatpush1.bf16.xpose.msra.mxu0 %v1887_v41 }
  0x4d   : > { %1278 = vmatprep.subr.bf16.mxu0 %v1898_v42 }
  0x53   : > { %1270 = vmatmul.mubr.bf16.vlgmr.msra.gmra.mrb[0].mxu0 %v1893_v43 }
  0x54   : > { %1279 = vmatpush1.bf16.xpose.msra.mxu0 %v1896_v44  ;;  %1310 = vmatprep.mubr.bf16.mxu0 %v1913_v45 }
  0x55   : > { %1280 = vmatprep.subr.bf16.mxu0 %v1904_v46 }
  0x5c   : > { %1281 = vmatpush1.bf16.xpose.msra.mxu0 %v1902_v47  ;;  %v1655_v47 = vld [vmem:[%s2404_s10] ss:$0 sm:$0xff] }
  0x5d   : > { %1722 = vmatprep.subr.bf16.mxu0 %v1991_v48 }
  0x63   : > { %1311 = vmatmul.mubr.bf16.vlgmr.msra.gmra.mrb[0].mxu0 %v1911_v50 }
  0x64   : > { %1723 = vmatpush3.bf16.xpose.msra.mxu0 %v1027_v51  ;;  %1726 = vmatprep.mubr.msk.bf16.mxu0 %vm1992_vm5, %v1991_v48 }
  0x65   : > { %1724 = vmatprep.subr.bf16.mxu0 %v1991_v48 }
  0x6c   : > { %1725 = vmatpush3.bf16.xpose.msra.mxu0 %v1030_v53 }
  0x73   : > { %1727 = vmatmul.mubr.msk.bf16.vlgmr.msra.gmra.mrb[0].mxu0 %vm1022_vm4, %v1922_v54 }
  0xfc   : > { %v1699_v56 = vpop.f32.mrb[0].mxu1 }
  0xfd   : > { %v534_v59 = vpop.f32.mrb[1].mxu1  ;;  %v540_v61 = vadd.f32 %v1699_v56, %v1583_v55 }
  0xfe   : > { %v535_v60 = vadd.f32 %v1583_v55, %v534_v59 }
 0x100   : > { %1708 = vmatprep.mubr.msk.f32.mxu1 %vm554_vm2, %v535_v60 }
 0x101   : > { %1709 = vmatmul.mubr.msk.f32.vlgmr.msra.gmra.mrb[2].mxu1 %vm554_vm2, %v540_v61 }
 0x102   : > { %1770 = vmatpush3.bf16.xpose.msk.msra.mxu1 %vm2116_vm1, %v2189_v22  ;;  %1719 = vmatprep.mubr.msk.f32.mxu1 %vm449_vm0, %v698_v63 }
 0x103   : > { %1773 = vmatprep.subr.msk.bf16.mxu1 %vm2116_vm1, %v1771_v62 }
 0x10a   : > { %1776 = vmatpush3.bf16.xpose.msk.msra.mxu1 %vm2116_vm1, %v1771_v62 }
 0x10b   : > { %1032 = vmatprep.subr.bf16.mxu1 %v1892_v0 }
 0x111   : > { %1720 = vmatmul.mubr.msk.f32.vlgmr.msra.gmra.mrb[4].mxu1 %vm449_vm0, %v699_v1 }
 0x112   : > { %1033 = vmatpush1.bf16.xpose.msra.mxu1 %v1890_v2  ;;  %1064 = vmatprep.mubr.bf16.mxu1 %v1907_v3 }
 0x113   : > { %1034 = vmatprep.subr.bf16.mxu1 %v1901_v5 }
 0x11a   : > { %1035 = vmatpush1.bf16.xpose.msra.mxu1 %v1899_v4 }
 0x11b   : > { %1073 = vmatprep.subr.bf16.mxu1 %v1910_v6 }
 0x121   : > { %1065 = vmatmul.mubr.bf16.vlgmr.msra.gmra.mrb[8].mxu1 %v1905_v7 }
 0x122   : > { %1074 = vmatpush1.bf16.xpose.msra.mxu1 %v1908_v8  ;;  %1105 = vmatprep.mubr.bf16.mxu1 %v1921_v9 }
 0x123   : > { %1075 = vmatprep.subr.bf16.mxu1 %v1917_v11 }
 0x12a   : > { %1076 = vmatpush1.bf16.xpose.msra.mxu1 %v1915_v12 }
 0x12b   : > { %1779 = vmatprep.subr.msk.bf16.mxu1 %vm2151_vm3, %v1777_v16 }
 0x131   : > { %1106 = vmatmul.mubr.bf16.vlgmr.msra.gmra.mrb[12].mxu1 %v1919_v13 }
 0x132   : > { %1782 = vmatpush3.bf16.xpose.msk.msra.mxu1 %vm2151_vm3, %v1777_v16 }
 0x133   : > { %1785 = vmatprep.subr.msk.bf16.mxu1 %vm2151_vm3, %v1783_v19 }
 0x13a   : > { %1788 = vmatpush3.bf16.xpose.msk.msra.mxu1 %vm2151_vm3, %v1783_v19 }
 0x146   : > { %v1353_v20 = vpop.f32.mrb[0].mxu0 }
 0x147   : > { %v1728_v21 = vpop.f32.mrb[1].mxu0 }
 0x148   : > { %v1356_v22 = vpop.f32.mrb[2].mxu0 }
 0x149   : > { %v1729_v23 = vpop.f32.mrb[3].mxu0 }
 0x1d4   : > { %v1710_v25 = vpop.f32.mrb[2].mxu1 }
 0x1d5   : > { %v645_v26 = vadd.f32 %v1710_v25, %v1590_v24  ;;  %v639_v27 = vpop.f32.mrb[3].mxu1 }
 0x1d6   : > { %v640_v28 = vadd.f32 %v1590_v24, %v639_v27 }
 0x1d8   : > { %1923 = vtanh.f32 %v640_v28 }
 0x1d9   : > { %1925 = vtanh.f32 %v645_v26 }
 0x1e2   : > { %v1924_v29 = vpop.eup %1923 }
 0x1e3   : > { %v1926_v30 = vpop.eup %1925  ;;  %1738 = vmatprep.mubr.msk.f32.mxu1 %vm554_vm2, %v1924_v29 }
 0x1e4   : > { %1739 = vmatmul.mubr.msk.f32.vlgmr.msra.gmra.mrb[6].mxu1 %vm554_vm2, %v1926_v30  ;;  %v1721_v10 = vpop.f32.mrb[4].mxu1 }
 0x1e5   : > { %v788_v31 = vpop.f32.mrb[5].mxu1 }
 0x1f4   : > { %v1066_v32 = vpop.f32.mrb[8].mxu1 }
 0x1f5   : > { %v1067_v33 = vadd.f32 %v1066_v32, %v788_v31  ;;  %v1068_v34 = vpop.f32.mrb[9].mxu1 }
 0x1f6   : > { %v1069_v35 = vpop.f32.mrb[10].mxu1 }
 0x1f7   : > { %v1070_v36 = vadd.f32 %v1721_v10, %v1069_v35  ;;  %v1071_v37 = vpop.f32.mrb[11].mxu1 }
 0x204   : > { %v1107_v38 = vpop.f32.mrb[12].mxu1 }
 0x205   : > { %v1108_v39 = vadd.f32 %v1107_v38, %v1067_v33  ;;  %v1109_v40 = vpop.f32.mrb[13].mxu1 }
 0x206   : > { %v1110_v41 = vpop.f32.mrb[14].mxu1 }
 0x207   : > { %v1790_v42 = vadd.f32 %v1353_v20, %v1108_v39  ;;  %v1111_v43 = vadd.f32 %v1110_v41, %v1070_v36  ;;  %v1112_v44 = vpop.f32.mrb[15].mxu1 }
 0x209   : > { %v1792_v45 = vadd.f32 %v1356_v22, %v1111_v43 }
 0x2b7   : > { %v1740_v46 = vpop.f32.mrb[6].mxu1 }
 0x2b8   : > { %v1458_v48 = vadd.f32 %v1792_v45, %v1740_v46  ;;  %v1448_v49 = vpop.f32.mrb[7].mxu1 }
 0x2b9   : > { %v1457_v50 = vadd.f32 %v1790_v42, %v1448_v49 }
 0x2ba   : > { %v1467_v51 = vadd.f32 %v1655_v47, %v1458_v48 }
 0x2bb   : > { %v1466_v52 = vadd.f32 %v1655_v47, %v1457_v50 }
 0x2bc   : > { %v1469_v53 = vmax.f32 %v1467_v51, 0.0 }
 0x2bd   : > { %v1468_v54 = vmax.f32 %v1466_v52, 0.0 }
 0x2be   : > { %1471 = vst.msk [vmem:[%s414_s3 + $0x8] sm:$0xff] %vm554_vm2, %v1469_v53 }
 0x2bf   : > { %1470 = vst.msk [vmem:[%s414_s3] sm:$0xff] %vm554_vm2, %v1468_v54 }
 0x2c0   : > { %1940 = shalt.err (!%p1937_p3)
}
 0x2c1   : > { %s1941_s24 = scalar_lea.hbm %s2347_s16, 256  ;;  %s1945_s3 = scalar_lea.hbm %s2405_s11, 512 }
 0x2c2   : > { %p1942_p4 = scmp.ne.s32.totalorder %s2347_s16, %s1941_s24  ;;  %p1946_p9 = scmp.lt.u32.totalorder %s2347_s16, %s2405_s11 }
 0x2c3   : > { %p1947_p10 = scmp.lt.u32.totalorder %s1945_s3, %s1941_s24  ;;  %p1949_p12 = scmp.lt.u32.totalorder %s1941_s24, %s2347_s16 }
 0x2c4   : > { %p1943_p7 = pnand %p1942_p4, %p2094_p5 }
 0x2c5   : > { %p1948_p11 = por %p1947_p10, %p1946_p9 }
 0x2c6   : > { %p1944_p8 = pneg %p1943_p7 }
 0x2c7   : > { %p1950_p13 = por %p1949_p12, %p1948_p11 }
 0x2c9   : > { %p1951_p0 = pnand %p1950_p13, %p1944_p8 }
 0x2cb   : > { %1954 = shalt.err (!%p1951_p0)
}
 0x2cc   : > { %s1994_s14 = smov 128   ;;  %s1995_s22 = smov 8  }
 0x2cd   : > { %1814 = dma.vmem_to_hbm [thread:$0]  (%p2094_p5), %s2349_s13, 256, %s2347_s16, %s2353_s21, %s1994_s14, %s1994_s14, %s1995_s22  }
 0x2ce PF: > { %p1820_p1 = scmp.ge.s32.totalorder %s1989_s20, 2  ;;  %s1501_s29 = sand.u32 1, %s1977_s17  }
 0x2cf   : > { %s1502_s30 = scalar_lea.sflag [#allocation3], %s1501_s29 }
 0x2d0   : > { %p1817_p2 = pnand %p1820_p1, %p2098_p6 }
 0x2d2   : > { %1972 = dma.done.wait (!%p1817_p2), %s1502_s30, 256  }
 0x2d3   : > { %1974 = vsyncadd (!%p1817_p2), %s1502_s30, 4294967040  ;;  %s2415_s24 = sld [smem:[#allocation5_spill]]  ;;  %p21_p3 = scmp.ge.s32.totalorder %s2081_s23, 4  }
 0x2d4   : > { %s2416_s17 = smov %s1981_s18  ;;  %s2417_s18 = smov %s1985_s19 }
 0x2d5   : > { %s2419_s20 = smov %s2081_s23  ;;  %23 = sbr.rel (!%p21_p3) target bundleno = 5 (0x5), region = 105 }
 0x2d9   : > { %s2418_s19 = smov %s2415_s24 }
 0x2dc   :  { %1507 = vsyncpa [#allocation3], 1 }
 0x2dd   :  { %1509 = vsyncpa [#allocation3 + $0x1], 1 }

</bundles_post_ra>
